<compile_context>
chip_gen: v7x
topology: tpu7x:2x2x1
jax: 0.10.0
libtpu: 0.0.40
codegen_flags: <defaults>
</compile_context>

<pallas_src>
import math
from functools import partial

import numpy as np
import jax
import jax.numpy as jnp
from jax.experimental import pallas as pl
from jax.experimental.pallas import tpu as pltpu

GAMMA = 2.0          # SigmoidFocalLoss gamma (fixed 2.0 -> explicit squaring)
FOCAL_ALPHA = 0.25   # SigmoidFocalLoss alpha
THRESHOLD = 0.5      # matching threshold
REG_WEIGHT = 1.0     # config.reg_weights (self.alpha)
N_CLASSES_CFG = 9    # config.n_classes  (scores carry n_classes - 1 channels)
_LANES = 128


def _cdiv(a, b):
    return -(-a // b)


def _round_up(a, b):
    return _cdiv(a, b) * b


# ----------------------- box coding / matching glue (host) -------------------

def cxcy_to_xy(cxcy):
    return np.concatenate([cxcy[:, :2] - cxcy[:, 2:] / 2.,
                           cxcy[:, :2] + cxcy[:, 2:] / 2.], axis=1)


def xy_to_cxcy(xy):
    return np.concatenate([(xy[:, 2:] + xy[:, :2]) / 2.,
                           xy[:, 2:] - xy[:, :2]], axis=1)


def cxcy_to_gcxgcy(cxcy, priors_cxcy):
    return np.concatenate(
        [(cxcy[:, :2] - priors_cxcy[:, :2]) / (priors_cxcy[:, 2:] / 10.),
         np.log(cxcy[:, 2:] / priors_cxcy[:, 2:]) * 5.], axis=1)


def find_jaccard_overlap(set1, set2):
    lo = np.maximum(set1[:, None, :2], set2[None, :, :2])
    hi = np.minimum(set1[:, None, 2:], set2[None, :, 2:])
    wh = np.clip(hi - lo, 0., None)
    inter = wh[..., 0] * wh[..., 1]
    a1 = (set1[:, 2] - set1[:, 0]) * (set1[:, 3] - set1[:, 1])
    a2 = (set2[:, 2] - set2[:, 0]) * (set2[:, 3] - set2[:, 1])
    union = a1[:, None] + a2[None, :] - inter
    return inter / union


def assign_targets(boxes_i, labels_i, priors_xy, priors_cxcy, threshold):
    # TODO(synk): data-dependent argmax/index_fill matching (ragged per-image
    # boxes) stays in host NumPy glue rather than in the Pallas kernel.
    overlap = find_jaccard_overlap(boxes_i, priors_xy)           # (n_obj, P)
    overlap_for_each_prior = overlap.max(axis=0)
    object_for_each_prior = overlap.argmax(axis=0)
    overlap_for_each_object = overlap.max(axis=1)
    prior_for_each_object = overlap.argmax(axis=1)
    prior_for_each_object = prior_for_each_object[overlap_for_each_object > 0]
    if len(prior_for_each_object) > 0:
        overlap_for_each_prior[prior_for_each_object] = 1.0
    for j in range(prior_for_each_object.shape[0]):
        object_for_each_prior[prior_for_each_object[j]] = j
    label_for_each_prior = labels_i[object_for_each_prior].copy()
    label_for_each_prior[overlap_for_each_prior < threshold] = -1
    label_for_each_prior[overlap_for_each_prior < threshold - 0.1] = 0
    true_locs = cxcy_to_gcxgcy(xy_to_cxcy(boxes_i[object_for_each_prior]),
                               priors_cxcy)
    return label_for_each_prior.astype(np.int32), true_locs.astype(np.float32)


# ----------------------------- Pallas loss kernel ----------------------------

def _loss_kernel(scores_ref, tcls_ref, locs_ref, tlocs_ref, pos_ref,
                 facc_ref, l1acc_ref, nacc_ref, *, n_cls):
    """Per-step focal + masked smooth-L1 partial sums.

    scores_ref : (rows_s, 128)  logits, natural prior-major/class-minor flat view
    tcls_ref   : (rows_s, 128)  int32 target class per score element (-1 = ignore)
    locs_ref   : (rows_l, 128)  predicted offsets, prior-major/coord-minor flat view
    tlocs_ref  : (rows_l, 128)  encoded target offsets, same layout
    pos_ref    : (rows_l, 128)  f32 {0,1} positive-prior mask per loc element
    facc/l1acc/nacc : (1, 128)  resident per-chunk accumulators (f32)
    """
    # Resident accumulators: init at the first step of each chunk.
    @pl.when(pl.program_id(1) == 0)
    def _():
        facc_ref[...] = jnp.zeros_like(facc_ref)
        l1acc_ref[...] = jnp.zeros_like(l1acc_ref)
        nacc_ref[...] = jnp.zeros_like(nacc_ref)

    # bf16 inputs are upcast here (f32 accumulation either way).
    x = scores_ref[...].astype(jnp.float32)             # (rows_s, 128)
    t = tcls_ref[...]                                    # (rows_s, 128) int32

    # class id (1..n_cls) of each flattened score element
    lane = jax.lax.broadcasted_iota(jnp.int32, x.shape, 1)
    if _LANES % n_cls == 0:
        cls_idx = lane % n_cls + 1                       # row-independent
    else:
        rows = x.shape[0]
        base = (pl.program_id(0) * pl.num_programs(1) + pl.program_id(1)) * rows
        row = jax.lax.broadcasted_iota(jnp.int32, x.shape, 0) + base
        cls_idx = (row * _LANES + lane) % n_cls + 1

    # Numerically-stable log-sigmoid pieces: exp + log on the EUP, reciprocal
    # via approx EUP vrcp + one Newton step (full f32 accuracy, cheaper than a
    # true divide).
    a = jnp.abs(x)
    e = jnp.exp(-a)                                      # exp(-|x|) in (0, 1]
    d = 1.0 + e
    log1pe = jnp.log(d)                                  # softplus(-|x|)
    r = pl.reciprocal(d, approx=True)
    inv = r * (2.0 - d * r)                              # 1 / (1 + e)

    nonneg = x >= 0.0
    is_pos = t == cls_idx
    # Single-branch sigmoid focal loss (gamma = 2):
    #   positive : -alpha     * (1-p)^2 * log(p)
    #   negative : (alpha-1)  *   p^2   * log(1-p)   (only where t >= 0)
    sq = inv * jnp.where(is_pos == nonneg, e, 1.0)       # (1-p) or p, selected
    sgn_x = jnp.where(is_pos, -x, x)
    logterm = -jnp.maximum(sgn_x, 0.0) - log1pe          # log(p) or log(1-p)
    coeff = jnp.where(t >= 0,
                      jnp.where(is_pos, -FOCAL_ALPHA, FOCAL_ALPHA - 1.0),
                      0.0)
    focal = (coeff * sq) * (sq * logterm)
    # Sublane reduce before accumulating: one tiny (1,128) RMW per step instead
    # of a block-sized accumulator read-modify-write.
    facc_ref[...] += jnp.sum(focal, axis=0, keepdims=True)

    # Smooth-L1 over positive priors (masked; the mean is applied in the wrapper).
    diff = locs_ref[...].astype(jnp.float32) - tlocs_ref[...].astype(jnp.float32)
    ad = jnp.abs(diff)
    sl1 = jnp.where(ad < 1.0, (0.5 * ad) * ad, ad - 0.5)
    pos = pos_ref[...]                                   # (rows_l, 128) f32
    l1acc_ref[...] += jnp.sum(sl1 * pos, axis=0, keepdims=True)
    nacc_ref[...] += jnp.sum(pos, axis=0, keepdims=True)


def _chunk_config():
    """(num_chunks, semantics) for grid axis 0, keyed to the chip generation.

    v7x (2 TensorCores/chip)  -> 2 chunks, CORE_PARALLEL (real core sharding)
    v4 / v5p (megacore)       -> 2 chunks, "parallel"
    v5e / v6e (1 TC/chip)     -> 1 chunk (the axis would be pure overhead)
    """
    try:
        dev = jax.devices()[0]
        if dev.platform == "tpu":
            kind = dev.device_kind.lower()
            if "7" in kind:
                return 2, pltpu.CORE_PARALLEL
            if ("v4" in kind) or ("v5p" in kind):
                return 2, "parallel"
    except Exception:
        pass
    return 1, "arbitrary"


@partial(jax.jit, static_argnames=("reg_weight", "ppb_target"))
def retina_focal_loss(predicted_locs, predicted_scores, true_locs_encoded,
                      true_classes, reg_weight=REG_WEIGHT, ppb_target=32768):
    """ppb_target = priors per grid step (big steps amortize ~0.35us/step)."""
    N, P, C = predicted_scores.shape
    T = N * P
    num_chunks, chunk_sem = _chunk_config()

    # Alignment so every flat stream tiles into whole (8,128)-aligned blocks.
    align = math.lcm(256, 1024 // math.gcd(C, 1024))
    ppb_target = max(align, int(ppb_target))
    steps = max(1, _cdiv(T, num_chunks * ppb_target))
    ppb = _round_up(_cdiv(T, num_chunks * steps), align)
    T_pad = num_chunks * steps * ppb
    pad = T_pad - T

    # Natural contiguous layout -> free flat views (no transpose, no cast).
    scores_flat = predicted_scores.reshape(-1)           # (T*C,)
    locs_flat = predicted_locs.reshape(-1)               # (T*4,)
    tlocs_flat = true_locs_encoded.reshape(-1)           # (T*4,)
    cls_flat = true_classes.reshape(-1).astype(jnp.int32)
    if pad:
        # TODO(synk): for unaligned prior counts this pad is one streaming copy
        # per tensor; feed an aligned T upstream to make prep fully copy-free.
        scores_flat = jnp.pad(scores_flat, (0, pad * C))
        locs_flat = jnp.pad(locs_flat, (0, pad * 4))
        tlocs_flat = jnp.pad(tlocs_flat, (0, pad * 4))
        cls_flat = jnp.pad(cls_flat, (0, pad), constant_values=-1)   # ignored

    # Per-element target class / positive mask, built from the small (T,) class
    # vector (the only wrapper-side expansion; fuses with the pad under jit).
    tcls = jnp.repeat(cls_flat, C)                                    # (T_pad*C,)
    pos4 = jnp.repeat((cls_flat > 0).astype(jnp.float32), 4)          # (T_pad*4,)

    scores2 = scores_flat.reshape(-1, _LANES)
    tcls2 = tcls.reshape(-1, _LANES)
    locs2 = locs_flat.reshape(-1, _LANES)
    tlocs2 = tlocs_flat.reshape(-1, _LANES)
    pos2 = pos4.reshape(-1, _LANES)

    rows_s = ppb * C // _LANES          # score rows per grid step
    rows_l = ppb * 4 // _LANES          # loc rows per grid step
    in_row_map = lambda c, i: (c * steps + i, 0)
    out_map = lambda c, i: (c, 0, 0)

    facc, l1acc, nacc = pl.pallas_call(
        partial(_loss_kernel, n_cls=C),
        out_shape=(jax.ShapeDtypeStruct((num_chunks, 1, _LANES), jnp.float32),
                   jax.ShapeDtypeStruct((num_chunks, 1, _LANES), jnp.float32),
                   jax.ShapeDtypeStruct((num_chunks, 1, _LANES), jnp.float32)),
        grid_spec=pltpu.PrefetchScalarGridSpec(
            num_scalar_prefetch=0,
            grid=(num_chunks, steps),
            in_specs=[pl.BlockSpec((rows_s, _LANES), in_row_map),
                      pl.BlockSpec((rows_s, _LANES), in_row_map),
                      pl.BlockSpec((rows_l, _LANES), in_row_map),
                      pl.BlockSpec((rows_l, _LANES), in_row_map),
                      pl.BlockSpec((rows_l, _LANES), in_row_map)],
            out_specs=[pl.BlockSpec((None, 1, _LANES), out_map),
                       pl.BlockSpec((None, 1, _LANES), out_map),
                       pl.BlockSpec((None, 1, _LANES), out_map)]),
        compiler_params=pltpu.CompilerParams(
            dimension_semantics=(chunk_sem, "arbitrary"),
            vmem_limit_bytes=32 * 1024 * 1024),
    )(scores2, tcls2, locs2, tlocs2, pos2)

    # Tiny final reductions (a few hundred elements) in plain XLA.
    n_pos4 = jnp.sum(nacc)                            # = 4 * n_positives
    # NOTE: clamp to >= 1 to avoid inf/NaN on degenerate batches (the reference
    # divides by zero there); identical to the reference whenever npos > 0.
    n_pos_safe = jnp.maximum(n_pos4 * 0.25, 1.0)
    conf_loss = jnp.sum(facc) / n_pos_safe
    loc_loss = jnp.sum(l1acc) / jnp.maximum(n_pos4, 1.0)   # mean over (npos, 4)
    return conf_loss + reg_weight * loc_loss


# ------------------------------- reference -----------------------------------

def reference_loss(pred_locs, pred_scores, true_locs, true_cls):
    N, P, C = pred_scores.shape
    t = true_cls.reshape(-1, 1).astype(np.int64)
    logits = pred_scores.reshape(-1, C).astype(np.float64)
    cr = np.arange(1, C + 1, dtype=np.int64)[None, :]
    p = 1.0 / (1.0 + np.exp(-logits))
    term1 = (1.0 - p) ** 2 * np.log(p)
    term2 = p ** 2 * np.log(1.0 - p)
    focal = (-(t == cr).astype(np.float64) * term1 * FOCAL_ALPHA
             - ((t != cr) & (t >= 0)).astype(np.float64) * term2 * (1.0 - FOCAL_ALPHA))
    npos = (true_cls > 0).sum()
    conf_loss = focal.sum() / npos
    pos = true_cls > 0
    d = pred_locs[pos] - true_locs[pos]
    ad = np.abs(d)
    loc_loss = np.where(ad < 1.0, 0.5 * ad * ad, ad - 0.5).mean()
    return conf_loss + REG_WEIGHT * loc_loss


# --------------------------------- main ---------------------------------------

if __name__ == "__main__":
    key = jax.random.PRNGKey(0)
    N, P, C = 2, 512, N_CLASSES_CFG - 1
    k1, k2, k3, k4 = jax.random.split(key, 4)

    # deterministic synthetic priors (cx, cy, w, h)
    cxy = jax.random.uniform(k1, (P, 2), minval=0.1, maxval=0.9)
    wh = jax.random.uniform(k2, (P, 2), minval=0.05, maxval=0.4)
    priors_cxcy = np.asarray(jnp.concatenate([cxy, wh], axis=1), dtype=np.float32)
    priors_xy = cxcy_to_xy(priors_cxcy)

    predicted_locs = jax.random.normal(k3, (N, P, 4), dtype=jnp.float32)
    predicted_scores = jax.random.normal(k4, (N, P, C), dtype=jnp.float32)

    # ground truth: list of per-image boxes (xyxy in [0,1]) and labels (1..C)
    boxes = [np.array([[0.10, 0.10, 0.45, 0.50],
                       [0.50, 0.55, 0.90, 0.95],
                       [0.30, 0.20, 0.70, 0.60]], dtype=np.float32),
             np.array([[0.05, 0.40, 0.40, 0.80],
                       [0.55, 0.10, 0.95, 0.45]], dtype=np.float32)]
    labels = [np.array([1, 3, 5], dtype=np.int32),
              np.array([2, 7], dtype=np.int32)]

    true_cls = np.zeros((N, P), dtype=np.int32)
    true_locs = np.zeros((N, P, 4), dtype=np.float32)
    for i in range(N):
        true_cls[i], true_locs[i] = assign_targets(
            boxes[i], labels[i], priors_xy, priors_cxcy, THRESHOLD)

    loss = retina_focal_loss(predicted_locs, predicted_scores,
                             jnp.asarray(true_locs), jnp.asarray(true_cls))
    loss = jax.block_until_ready(loss)

    ref = reference_loss(np.asarray(predicted_locs), np.asarray(predicted_scores),
                         true_locs, true_cls)
    np.testing.assert_allclose(float(loss), float(ref), rtol=2e-3, atol=2e-3)
    print("KERNEL_OK")
</pallas_src>

<mosaic_0001>
module attributes {stable_mosaic.version = 11 : i64} {
  func.func @_loss_kernel(%arg0: i32, %arg1: i32, %arg2: memref<64x128xf32, #tpu.memory_space<vmem>>, %arg3: memref<64x128xi32, #tpu.memory_space<vmem>>, %arg4: memref<32x128xf32, #tpu.memory_space<vmem>>, %arg5: memref<32x128xf32, #tpu.memory_space<vmem>>, %arg6: memref<32x128xf32, #tpu.memory_space<vmem>>, %arg7: memref<1x1x128xf32, #tpu.memory_space<vmem>>, %arg8: memref<1x1x128xf32, #tpu.memory_space<vmem>>, %arg9: memref<1x1x128xf32, #tpu.memory_space<vmem>>) attributes {dimension_semantics = [#tpu.dimension_semantics<arbitrary>, #tpu.dimension_semantics<arbitrary>], iteration_bounds = array<i64: 1, 1>, scalar_prefetch = 0 : i64, scratch_operands = 0 : i64, tpu.core_type = #tpu.core_type<tc>, window_params = [{transform_indices = @transform_0, window_bounds = array<i64: 64, 128>}, {transform_indices = @transform_1, window_bounds = array<i64: 64, 128>}, {transform_indices = @transform_2, window_bounds = array<i64: 32, 128>}, {transform_indices = @transform_3, window_bounds = array<i64: 32, 128>}, {transform_indices = @transform_4, window_bounds = array<i64: 32, 128>}, {transform_indices = @transform_5, window_bounds = array<i64: 1, 1, 128>}, {transform_indices = @transform_6, window_bounds = array<i64: 1, 1, 128>}, {transform_indices = @transform_7, window_bounds = array<i64: 1, 1, 128>}]} {
    %c0_i32 = arith.constant 0 : i32
    %0 = arith.cmpi eq, %arg1, %c0_i32 : i32
    %1 = arith.extui %0 : i1 to i32
    %c0_i32_0 = arith.constant 0 : i32
    %2 = arith.cmpi ne, %1, %c0_i32_0 : i32
    scf.if %2 {
      %cst_51 = arith.constant 0.000000e+00 : f32
      %100 = vector.broadcast %cst_51 : f32 to vector<1x128xf32>
      %c0_52 = arith.constant 0 : index
      %c0_53 = arith.constant 0 : index
      %c0_54 = arith.constant 0 : index
      %101 = vector.load %arg7[%c0_52, %c0_53, %c0_54] : memref<1x1x128xf32, #tpu.memory_space<vmem>>, vector<1x1x128xf32>
      %102 = vector.shape_cast %101 : vector<1x1x128xf32> to vector<1x128xf32>
      %103 = vector.shape_cast %100 : vector<1x128xf32> to vector<1x1x128xf32>
      tpu.vector_store %arg7[%c0_52, %c0_53, %c0_54], %103 {strides = array<i32>} : memref<1x1x128xf32, #tpu.memory_space<vmem>>, vector<1x1x128xf32>,
      %cst_55 = arith.constant 0.000000e+00 : f32
      %104 = vector.broadcast %cst_55 : f32 to vector<1x128xf32>
      %c0_56 = arith.constant 0 : index
      %c0_57 = arith.constant 0 : index
      %c0_58 = arith.constant 0 : index
      %105 = vector.load %arg8[%c0_56, %c0_57, %c0_58] : memref<1x1x128xf32, #tpu.memory_space<vmem>>, vector<1x1x128xf32>
      %106 = vector.shape_cast %105 : vector<1x1x128xf32> to vector<1x128xf32>
      %107 = vector.shape_cast %104 : vector<1x128xf32> to vector<1x1x128xf32>
      tpu.vector_store %arg8[%c0_56, %c0_57, %c0_58], %107 {strides = array<i32>} : memref<1x1x128xf32, #tpu.memory_space<vmem>>, vector<1x1x128xf32>,
      %cst_59 = arith.constant 0.000000e+00 : f32
      %108 = vector.broadcast %cst_59 : f32 to vector<1x128xf32>
      %c0_60 = arith.constant 0 : index
      %c0_61 = arith.constant 0 : index
      %c0_62 = arith.constant 0 : index
      %109 = vector.load %arg9[%c0_60, %c0_61, %c0_62] : memref<1x1x128xf32, #tpu.memory_space<vmem>>, vector<1x1x128xf32>
      %110 = vector.shape_cast %109 : vector<1x1x128xf32> to vector<1x128xf32>
      %111 = vector.shape_cast %108 : vector<1x128xf32> to vector<1x1x128xf32>
      tpu.vector_store %arg9[%c0_60, %c0_61, %c0_62], %111 {strides = array<i32>} : memref<1x1x128xf32, #tpu.memory_space<vmem>>, vector<1x1x128xf32>,
    } else {
    }
    %c0 = arith.constant 0 : index
    %c0_1 = arith.constant 0 : index
    %3 = vector.load %arg2[%c0, %c0_1] : memref<64x128xf32, #tpu.memory_space<vmem>>, vector<64x128xf32>
    %c0_2 = arith.constant 0 : index
    %c0_3 = arith.constant 0 : index
    %4 = vector.load %arg3[%c0_2, %c0_3] : memref<64x128xi32, #tpu.memory_space<vmem>>, vector<64x128xi32>
    %5 = tpu.iota {dimensions = array<i32: 1>} : vector<64x128xi32>
    %c8_i32 = arith.constant 8 : i32
    %c0_i32_4 = arith.constant 0 : i32
    %6 = arith.cmpi eq, %c8_i32, %c0_i32_4 : i32
    %c1_i32 = arith.constant 1 : i32
    %7 = arith.select %6, %c1_i32, %c8_i32 : i32
    %8 = vector.broadcast %7 : i32 to vector<64x128xi32>
    %9 = arith.remsi %5, %8 : vector<64x128xi32>
    %c0_i32_5 = arith.constant 0 : i32
    %10 = vector.broadcast %c0_i32_5 : i32 to vector<64x128xi32>
    %11 = arith.cmpi ne, %9, %10 : vector<64x128xi32>
    %c0_i32_6 = arith.constant 0 : i32
    %12 = vector.broadcast %c0_i32_6 : i32 to vector<64x128xi32>
    %13 = arith.cmpi slt, %9, %12 : vector<64x128xi32>
    %c0_i32_7 = arith.constant 0 : i32
    %14 = arith.cmpi slt, %7, %c0_i32_7 : i32
    %15 = vector.broadcast %14 : i1 to vector<64x128xi1>
    %16 = vector.broadcast %15 : vector<64x128xi1> to vector<64x128xi1>
    %17 = arith.xori %13, %16 : vector<64x128xi1>
    %18 = arith.andi %17, %11 : vector<64x128xi1>
    %19 = vector.broadcast %7 : i32 to vector<64x128xi32>
    %20 = arith.addi %9, %19 : vector<64x128xi32>
    %21 = arith.select %18, %20, %9 : vector<64x128xi1>, vector<64x128xi32>
    %c1_i32_8 = arith.constant 1 : i32
    %22 = vector.broadcast %c1_i32_8 : i32 to vector<64x128xi32>
    %23 = arith.addi %21, %22 : vector<64x128xi32>
    %24 = math.absf %3 : vector<64x128xf32>
    %cst = arith.constant 0.000000e+00 : f32
    %25 = vector.broadcast %cst : f32 to vector<64x128xf32>
    %26 = arith.subf %25, %24 : vector<64x128xf32>
    %27 = math.exp %26 : vector<64x128xf32>
    %cst_9 = arith.constant 1.000000e+00 : f32
    %28 = vector.broadcast %cst_9 : f32 to vector<64x128xf32>
    %29 = arith.addf %28, %27 : vector<64x128xf32>
    %30 = math.log %29 : vector<64x128xf32>
    %31 = tpu.reciprocal %29 {approx = true} : vector<64x128xf32> -> vector<64x128xf32>
    %32 = arith.mulf %29, %31 : vector<64x128xf32>
    %cst_10 = arith.constant 2.000000e+00 : f32
    %33 = vector.broadcast %cst_10 : f32 to vector<64x128xf32>
    %34 = arith.subf %33, %32 : vector<64x128xf32>
    %35 = arith.mulf %31, %34 : vector<64x128xf32>
    %cst_11 = arith.constant 0.000000e+00 : f32
    %36 = vector.broadcast %cst_11 : f32 to vector<64x128xf32>
    %37 = arith.cmpf oge, %3, %36 : vector<64x128xf32>
    %38 = arith.cmpi eq, %4, %23 : vector<64x128xi32>
    %39 = arith.xori %38, %37 : vector<64x128xi1>
    %cst_12 = arith.constant dense<true> : vector<64x128xi1>
    %40 = arith.xori %39, %cst_12 : vector<64x128xi1>
    %cst_13 = arith.constant 1.000000e+00 : f32
    %41 = vector.broadcast %cst_13 : f32 to vector<64x128xf32>
    %42 = arith.select %40, %27, %41 : vector<64x128xi1>, vector<64x128xf32>
    %43 = arith.mulf %35, %42 : vector<64x128xf32>
    %cst_14 = arith.constant 0.000000e+00 : f32
    %44 = vector.broadcast %cst_14 : f32 to vector<64x128xf32>
    %45 = arith.subf %44, %3 : vector<64x128xf32>
    %46 = arith.select %38, %45, %3 : vector<64x128xi1>, vector<64x128xf32>
    %cst_15 = arith.constant 0.000000e+00 : f32
    %47 = vector.broadcast %cst_15 : f32 to vector<64x128xf32>
    %48 = arith.maximumf %46, %47 : vector<64x128xf32>
    %cst_16 = arith.constant 0.000000e+00 : f32
    %49 = vector.broadcast %cst_16 : f32 to vector<64x128xf32>
    %50 = arith.subf %49, %48 : vector<64x128xf32>
    %51 = arith.subf %50, %30 : vector<64x128xf32>
    %c0_i32_17 = arith.constant 0 : i32
    %52 = vector.broadcast %c0_i32_17 : i32 to vector<64x128xi32>
    %53 = arith.cmpi sge, %4, %52 : vector<64x128xi32>
    %cst_18 = arith.constant -2.500000e-01 : f32
    %cst_19 = arith.constant -7.500000e-01 : f32
    %54 = vector.broadcast %cst_18 : f32 to vector<64x128xf32>
    %55 = vector.broadcast %cst_19 : f32 to vector<64x128xf32>
    %56 = arith.select %38, %54, %55 : vector<64x128xi1>, vector<64x128xf32>
    %cst_20 = arith.constant 0.000000e+00 : f32
    %57 = vector.broadcast %cst_20 : f32 to vector<64x128xf32>
    %58 = arith.select %53, %56, %57 : vector<64x128xi1>, vector<64x128xf32>
    %59 = arith.mulf %58, %43 : vector<64x128xf32>
    %60 = arith.mulf %43, %51 : vector<64x128xf32>
    %61 = arith.mulf %59, %60 : vector<64x128xf32>
    %c0_21 = arith.constant 0 : index
    %c0_22 = arith.constant 0 : index
    %c0_23 = arith.constant 0 : index
    %62 = vector.load %arg7[%c0_21, %c0_22, %c0_23] : memref<1x1x128xf32, #tpu.memory_space<vmem>>, vector<1x1x128xf32>
    %63 = vector.shape_cast %62 : vector<1x1x128xf32> to vector<1x128xf32>
    %cst_24 = arith.constant dense<0.000000e+00> : vector<128xf32>
    %64 = vector.multi_reduction <add>, %61, %cst_24 [0] : vector<64x128xf32> to vector<128xf32>
    %65 = vector.shape_cast %64 : vector<128xf32> to vector<1x128xf32>
    %66 = arith.addf %63, %65 : vector<1x128xf32>
    %c0_25 = arith.constant 0 : index
    %c0_26 = arith.constant 0 : index
    %c0_27 = arith.constant 0 : index
    %67 = vector.load %arg7[%c0_25, %c0_26, %c0_27] : memref<1x1x128xf32, #tpu.memory_space<vmem>>, vector<1x1x128xf32>
    %68 = vector.shape_cast %67 : vector<1x1x128xf32> to vector<1x128xf32>
    %69 = vector.shape_cast %66 : vector<1x128xf32> to vector<1x1x128xf32>
    tpu.vector_store %arg7[%c0_25, %c0_26, %c0_27], %69 {strides = array<i32>} : memref<1x1x128xf32, #tpu.memory_space<vmem>>, vector<1x1x128xf32>,
    %c0_28 = arith.constant 0 : index
    %c0_29 = arith.constant 0 : index
    %70 = vector.load %arg4[%c0_28, %c0_29] : memref<32x128xf32, #tpu.memory_space<vmem>>, vector<32x128xf32>
    %c0_30 = arith.constant 0 : index
    %c0_31 = arith.constant 0 : index
    %71 = vector.load %arg5[%c0_30, %c0_31] : memref<32x128xf32, #tpu.memory_space<vmem>>, vector<32x128xf32>
    %72 = arith.subf %70, %71 : vector<32x128xf32>
    %73 = math.absf %72 : vector<32x128xf32>
    %cst_32 = arith.constant 1.000000e+00 : f32
    %74 = vector.broadcast %cst_32 : f32 to vector<32x128xf32>
    %75 = arith.cmpf olt, %73, %74 : vector<32x128xf32>
    %cst_33 = arith.constant 5.000000e-01 : f32
    %76 = vector.broadcast %cst_33 : f32 to vector<32x128xf32>
    %77 = arith.mulf %76, %73 : vector<32x128xf32>
    %78 = arith.mulf %77, %73 : vector<32x128xf32>
    %cst_34 = arith.constant 5.000000e-01 : f32
    %79 = vector.broadcast %cst_34 : f32 to vector<32x128xf32>
    %80 = arith.subf %73, %79 : vector<32x128xf32>
    %81 = arith.select %75, %78, %80 : vector<32x128xi1>, vector<32x128xf32>
    %c0_35 = arith.constant 0 : index
    %c0_36 = arith.constant 0 : index
    %82 = vector.load %arg6[%c0_35, %c0_36] : memref<32x128xf32, #tpu.memory_space<vmem>>, vector<32x128xf32>
    %c0_37 = arith.constant 0 : index
    %c0_38 = arith.constant 0 : index
    %c0_39 = arith.constant 0 : index
    %83 = vector.load %arg8[%c0_37, %c0_38, %c0_39] : memref<1x1x128xf32, #tpu.memory_space<vmem>>, vector<1x1x128xf32>
    %84 = vector.shape_cast %83 : vector<1x1x128xf32> to vector<1x128xf32>
    %85 = arith.mulf %81, %82 : vector<32x128xf32>
    %cst_40 = arith.constant dense<0.000000e+00> : vector<128xf32>
    %86 = vector.multi_reduction <add>, %85, %cst_40 [0] : vector<32x128xf32> to vector<128xf32>
    %87 = vector.shape_cast %86 : vector<128xf32> to vector<1x128xf32>
    %88 = arith.addf %84, %87 : vector<1x128xf32>
    %c0_41 = arith.constant 0 : index
    %c0_42 = arith.constant 0 : index
    %c0_43 = arith.constant 0 : index
    %89 = vector.load %arg8[%c0_41, %c0_42, %c0_43] : memref<1x1x128xf32, #tpu.memory_space<vmem>>, vector<1x1x128xf32>
    %90 = vector.shape_cast %89 : vector<1x1x128xf32> to vector<1x128xf32>
    %91 = vector.shape_cast %88 : vector<1x128xf32> to vector<1x1x128xf32>
    tpu.vector_store %arg8[%c0_41, %c0_42, %c0_43], %91 {strides = array<i32>} : memref<1x1x128xf32, #tpu.memory_space<vmem>>, vector<1x1x128xf32>,
    %c0_44 = arith.constant 0 : index
    %c0_45 = arith.constant 0 : index
    %c0_46 = arith.constant 0 : index
    %92 = vector.load %arg9[%c0_44, %c0_45, %c0_46] : memref<1x1x128xf32, #tpu.memory_space<vmem>>, vector<1x1x128xf32>
    %93 = vector.shape_cast %92 : vector<1x1x128xf32> to vector<1x128xf32>
    %cst_47 = arith.constant dense<0.000000e+00> : vector<128xf32>
    %94 = vector.multi_reduction <add>, %82, %cst_47 [0] : vector<32x128xf32> to vector<128xf32>
    %95 = vector.shape_cast %94 : vector<128xf32> to vector<1x128xf32>
    %96 = arith.addf %93, %95 : vector<1x128xf32>
    %c0_48 = arith.constant 0 : index
    %c0_49 = arith.constant 0 : index
    %c0_50 = arith.constant 0 : index
    %97 = vector.load %arg9[%c0_48, %c0_49, %c0_50] : memref<1x1x128xf32, #tpu.memory_space<vmem>>, vector<1x1x128xf32>
    %98 = vector.shape_cast %97 : vector<1x1x128xf32> to vector<1x128xf32>
    %99 = vector.shape_cast %96 : vector<1x128xf32> to vector<1x1x128xf32>
    tpu.vector_store %arg9[%c0_48, %c0_49, %c0_50], %99 {strides = array<i32>} : memref<1x1x128xf32, #tpu.memory_space<vmem>>, vector<1x1x128xf32>,
    return
  }
  func.func @transform_0(%arg0: i32, %arg1: i32) -> (i32, i32) {
    %c1_i32 = arith.constant 1 : i32
    %0 = arith.muli %arg0, %c1_i32 : i32
    %1 = arith.addi %0, %arg1 : i32
    %c0_i32 = arith.constant 0 : i32
    %c0_i32_0 = arith.constant 0 : i32
    return %1, %c0_i32 : i32, i32
  }
  func.func @transform_1(%arg0: i32, %arg1: i32) -> (i32, i32) {
    %c1_i32 = arith.constant 1 : i32
    %0 = arith.muli %arg0, %c1_i32 : i32
    %1 = arith.addi %0, %arg1 : i32
    %c0_i32 = arith.constant 0 : i32
    %c0_i32_0 = arith.constant 0 : i32
    return %1, %c0_i32 : i32, i32
  }
  func.func @transform_2(%arg0: i32, %arg1: i32) -> (i32, i32) {
    %c1_i32 = arith.constant 1 : i32
    %0 = arith.muli %arg0, %c1_i32 : i32
    %1 = arith.addi %0, %arg1 : i32
    %c0_i32 = arith.constant 0 : i32
    %c0_i32_0 = arith.constant 0 : i32
    return %1, %c0_i32 : i32, i32
  }
  func.func @transform_3(%arg0: i32, %arg1: i32) -> (i32, i32) {
    %c1_i32 = arith.constant 1 : i32
    %0 = arith.muli %arg0, %c1_i32 : i32
    %1 = arith.addi %0, %arg1 : i32
    %c0_i32 = arith.constant 0 : i32
    %c0_i32_0 = arith.constant 0 : i32
    return %1, %c0_i32 : i32, i32
  }
  func.func @transform_4(%arg0: i32, %arg1: i32) -> (i32, i32) {
    %c1_i32 = arith.constant 1 : i32
    %0 = arith.muli %arg0, %c1_i32 : i32
    %1 = arith.addi %0, %arg1 : i32
    %c0_i32 = arith.constant 0 : i32
    %c0_i32_0 = arith.constant 0 : i32
    return %1, %c0_i32 : i32, i32
  }
  func.func @transform_5(%arg0: i32, %arg1: i32) -> (i32, i32, i32) {
    %c0_i32 = arith.constant 0 : i32
    %c0_i32_0 = arith.constant 0 : i32
    %c0_i32_1 = arith.constant 0 : i32
    return %arg0, %c0_i32, %c0_i32_0 : i32, i32, i32
  }
  func.func @transform_6(%arg0: i32, %arg1: i32) -> (i32, i32, i32) {
    %c0_i32 = arith.constant 0 : i32
    %c0_i32_0 = arith.constant 0 : i32
    %c0_i32_1 = arith.constant 0 : i32
    return %arg0, %c0_i32, %c0_i32_0 : i32, i32, i32
  }
  func.func @transform_7(%arg0: i32, %arg1: i32) -> (i32, i32, i32) {
    %c0_i32 = arith.constant 0 : i32
    %c0_i32_0 = arith.constant 0 : i32
    %c0_i32_1 = arith.constant 0 : i32
    return %arg0, %c0_i32, %c0_i32_0 : i32, i32, i32
  }
}

</mosaic_0001>

<bundles_post_ra>
// kernel: retina_focal_loss.1
= control target key start
LH: loop header
LB: loop body
LE: loop exit
PB: predicated region body
PF: predicated region fallthrough
CT: control target
= control target key end

     0   :  { %v156_v0 = vlaneseq  ;;  %v576_v1 = vmov 0.0   ;;  %s1225_s5 = inlined_call_operand.vmem [shape: f32[1,1,128], index: 5, kind: output, shape index: {0}]   ;;  %s1226_s6 = inlined_call_operand.vmem [shape: f32[1,1,128], index: 6, kind: output, shape index: {1}]   ;;  %s1227_s7 = inlined_call_operand.vmem [shape: f32[1,1,128], index: 7, kind: output, shape index: {2}]   ;;  %s1228_s0 = inlined_call_operand.vmem [shape: f32[64,128], index: 0, kind: input, shape index: {}]   ;;  %s1229_s1 = inlined_call_operand.vmem [shape: s32[64,128], index: 1, kind: input, shape index: {}]   ;;  %s1230_s2 = inlined_call_operand.vmem [shape: f32[32,128], index: 2, kind: input, shape index: {}]   ;;  %s1231_s3 = inlined_call_operand.vmem [shape: f32[32,128], index: 3, kind: input, shape index: {}]   ;;  %s1232_s4 = inlined_call_operand.vmem [shape: f32[32,128], index: 4, kind: input, shape index: {}]  }
   0x1   :  { %137 = vst [vmem:[%s1225_s5] sm:$0x1] %v576_v1  ;;  %138 = vst [vmem:[%s1226_s6] sm:$0x1] %v576_v1  ;;  %v631_v2 = vld [vmem:[%s1228_s0] sm:$0xff]  ;;  %v636_v3 = vld [vmem:[%s1228_s0 + $0x8] sm:$0xff] }
   0x2   :  { %139 = vst [vmem:[%s1227_s7] sm:$0x1] %v576_v1  ;;  %v641_v4 = vld [vmem:[%s1228_s0 + $0x10] sm:$0xff]  ;;  %v646_v5 = vld [vmem:[%s1228_s0 + $0x18] sm:$0xff]  ;;  %v157_v6 = vand.u32 127, %v156_v0  ;;  %v171_v7 = vand.u32 2147483647, %v631_v2 }
   0x3   :  { %v652_v8 = vld [vmem:[%s1228_s0 + $0x20] sm:$0xff]  ;;  %v657_v9 = vld [vmem:[%s1228_s0 + $0x28] sm:$0xff]  ;;  %v172_v10 = vand.u32 2147483647, %v636_v3  ;;  %v663_v11 = vld [vmem:[%s1228_s0 + $0x30] sm:$0xff]  ;;  %vm259_vm0 = vcmp.ge.f32.partialorder %v631_v2, 0.0 }
   0x4   :  { %v668_v12 = vld [vmem:[%s1228_s0 + $0x38] sm:$0xff]  ;;  %v162_v13 = vand.u32 7, %v157_v6  ;;  %v173_v14 = vand.u32 2147483647, %v641_v4  ;;  %v174_v15 = vand.u32 2147483647, %v646_v5 }
   0x5   :  { %v179_v16 = vsub.f32 0.0, %v171_v7  ;;  %v175_v18 = vand.u32 2147483647, %v652_v8  ;;  %v176_v19 = vand.u32 2147483647, %v657_v9  ;;  %v180_v22 = vsub.f32 0.0, %v172_v10 }
   0x6   :  { %v672_v17 = vadd.s32 1, %v162_v13  ;;  %v177_v20 = vand.u32 2147483647, %v663_v11  ;;  %v178_v21 = vand.u32 2147483647, %v668_v12  ;;  %v181_v23 = vsub.f32 0.0, %v173_v14 }
   0x7   :  { %v182_v24 = vsub.f32 0.0, %v174_v15  ;;  %v183_v25 = vsub.f32 0.0, %v175_v18  ;;  %v184_v26 = vsub.f32 0.0, %v176_v19  ;;  %v187_v27 = vmul.f32 1.442695, %v179_v16  ;;  %v682_v28 = vld [vmem:[%s1229_s1] sm:$0xff] }
   0x8   :  { %v687_v29 = vld [vmem:[%s1229_s1 + $0x8] sm:$0xff]  ;;  %v185_v30 = vsub.f32 0.0, %v177_v20  ;;  %v186_v31 = vsub.f32 0.0, %v178_v21  ;;  %v189_v32 = vmul.f32 1.442695, %v180_v22  ;;  %v692_v37 = vld [vmem:[%s1229_s1 + $0x10] sm:$0xff]  ;;  %vm267_vm8 = vcmp.eq.s32.totalorder %v682_v28, %v672_v17 }
   0x9   :  { %v191_v33 = vmul.f32 1.442695, %v181_v23  ;;  %528 = vpow2.f32 %v187_v27  ;;  %v193_v34 = vmul.f32 1.442695, %v182_v24  ;;  %v195_v35 = vmul.f32 1.442695, %v183_v25  ;;  %vm743_vm14 = vmxor %vm267_vm8, %vm259_vm0 }
   0xa   :  { %v197_v36 = vmul.f32 1.442695, %v184_v26  ;;  %530 = vpow2.f32 %v189_v32  ;;  %v199_v38 = vmul.f32 1.442695, %v185_v30  ;;  %v201_v39 = vmul.f32 1.442695, %v186_v31 }
   0xb   :  { %vm260_vm1 = vcmp.ge.f32.partialorder %v636_v3, 0.0  ;;  %v698_v40 = vld [vmem:[%s1229_s1 + $0x18] sm:$0xff]  ;;  %v703_v41 = vld [vmem:[%s1229_s1 + $0x20] sm:$0xff]  ;;  %v708_v42 = vld [vmem:[%s1229_s1 + $0x28] sm:$0xff]  ;;  %532 = vpow2.f32 %v191_v33  ;;  %vm261_vm2 = vcmp.ge.f32.partialorder %v641_v4, 0.0  ;;  %vm262_vm3 = vcmp.ge.f32.partialorder %v646_v5, 0.0 }
   0xc   :  { %vm263_vm4 = vcmp.ge.f32.partialorder %v652_v8, 0.0  ;;  %v716_v43 = vld [vmem:[%s1229_s1 + $0x30] sm:$0xff]  ;;  %v721_v44 = vld [vmem:[%s1229_s1 + $0x38] sm:$0xff]  ;;  %534 = vpow2.f32 %v193_v34  ;;  %vm264_vm5 = vcmp.ge.f32.partialorder %v657_v9, 0.0  ;;  %vm1239_vm9 = vcmp.eq.s32.totalorder %v687_v29, %v672_v17  ;;  %v411_v57 = vld [vmem:[%s1230_s2] sm:$0xff] }
   0xd   :  { %536 = vpow2.f32 %v195_v35  ;;  %vm1238_vm10 = vcmp.eq.s32.totalorder %v692_v37, %v672_v17  ;;  %vm1237_vm11 = vcmp.eq.s32.totalorder %v698_v40, %v672_v17  ;;  %vm1235_vm12 = vcmp.eq.s32.totalorder %v703_v41, %v672_v17  ;;  %vm756_vm6 = vmxor %vm1239_vm9, %vm260_vm1  ;;  %v412_v46 = vld [vmem:[%s1230_s2 + $0x8] sm:$0xff] }
   0xe   :  { %538 = vpow2.f32 %v197_v36  ;;  %vm1233_vm13 = vcmp.eq.s32.totalorder %v708_v42, %v672_v17  ;;  %vm1234_vm15 = vcmp.eq.s32.totalorder %v716_v43, %v672_v17  ;;  %vm1236_vm7 = vcmp.eq.s32.totalorder %v721_v44, %v672_v17  ;;  %vm766_vm0 = vmxor %vm1238_vm10, %vm261_vm2  ;;  %v416_v30 = vld [vmem:[%s1231_s3 + $0x8] sm:$0xff] }
   0xf   :  { %540 = vpow2.f32 %v199_v38  ;;  %v307_v47 = vsub.f32 0.0, %v631_v2  ;;  %v308_v49 = vsub.f32 0.0, %v636_v3  ;;  %v309_v50 = vsub.f32 0.0, %v641_v4  ;;  %vm778_vm1 = vmxor %vm1237_vm11, %vm262_vm3 }
  0x10   :  { %542 = vpow2.f32 %v201_v39  ;;  %v310_v51 = vsub.f32 0.0, %v646_v5  ;;  %v311_v53 = vsub.f32 0.0, %v652_v8  ;;  %v312_v54 = vsub.f32 0.0, %v657_v9  ;;  %vm791_vm2 = vmxor %vm1235_vm12, %vm263_vm4 }
  0x11   :  { %v313_v55 = vsub.f32 0.0, %v663_v11  ;;  %v314_v56 = vsub.f32 0.0, %v668_v12  ;;  %v315_v58 = vsel %vm267_vm8, %v307_v47, %v631_v2  ;;  %v316_v59 = vsel %vm1239_vm9, %v308_v49, %v636_v3  ;;  %vm818_vm3 = vmxor %vm1233_vm13, %vm264_vm5 }
  0x12   :  { %v317_v60 = vsel %vm1238_vm10, %v309_v50, %v641_v4  ;;  %v318_v61 = vsel %vm1237_vm11, %v310_v51, %v646_v5  ;;  %v319_v0 = vsel %vm1235_vm12, %v311_v53, %v652_v8  ;;  %v320_v1 = vsel %vm1233_vm13, %v312_v54, %v657_v9 }
  0x13   :  { %v811_v62 = vpop.eup %528  ;;  %vm1261_vm4 = vcmp.ge.f32.partialorder %v663_v11, 0.0  ;;  %v321_v5 = vsel %vm1234_vm15, %v313_v55, %v663_v11  ;;  %v322_v6 = vsel %vm1236_vm7, %v314_v56, %v668_v12  ;;  %v323_v7 = vmax.f32 %v315_v58, 0.0 }
  0x14   :  { %v830_v2 = vpop.eup %530  ;;  %v833_v3 = vadd.f32 1.0, %v811_v62  ;;  %vm840_vm5 = vmxor %vm1234_vm15, %vm1261_vm4  ;;  %vm1264_vm4 = vcmp.ge.f32.partialorder %v668_v12, 0.0  ;;  %v324_v11 = vmax.f32 %v316_v59, 0.0  ;;  %v325_v13 = vmax.f32 %v317_v60, 0.0 }
  0x15   :  { %v852_v8 = vpop.eup %532  ;;  %v855_v9 = vadd.f32 1.0, %v830_v2  ;;  %vm862_vm13 = vmxor %vm1236_vm7, %vm1264_vm4  ;;  %v326_v14 = vmax.f32 %v318_v61, 0.0  ;;  %vm577_vm15 = vmmov 1   ;;  %v327_v18 = vmax.f32 %v319_v0, 0.0 }
  0x16   :  { %v866_v15 = vpop.eup %534  ;;  %v869_v16 = vadd.f32 1.0, %v852_v8  ;;  %544 = vlog2.f32 %v833_v3  ;;  %vm875_vm12 = vmxor %vm743_vm14, %vm577_vm15  ;;  %v328_v19 = vmax.f32 %v320_v1, 0.0  ;;  %v329_v23 = vmax.f32 %v321_v5, 0.0 }
  0x17   :  { %v879_v20 = vpop.eup %536  ;;  %v882_v21 = vadd.f32 1.0, %v866_v15  ;;  %546 = vlog2.f32 %v855_v9  ;;  %vm888_vm4 = vmxor %vm756_vm6, %vm577_vm15  ;;  %v330_v24 = vmax.f32 %v322_v6, 0.0  ;;  %v908_v31 = vsub.f32 0.0, %v323_v7 }
  0x18   :  { %v892_v25 = vpop.eup %538  ;;  %v895_v26 = vadd.f32 1.0, %v879_v20  ;;  %548 = vlog2.f32 %v869_v16  ;;  %vm901_vm14 = vmxor %vm766_vm0, %vm577_vm15  ;;  %v926_v36 = vsub.f32 0.0, %v324_v11  ;;  %v944_v47 = vsub.f32 0.0, %v325_v13 }
  0x19   :  { %v910_v32 = vpop.eup %540  ;;  %v913_v33 = vadd.f32 1.0, %v892_v25  ;;  %550 = vlog2.f32 %v882_v21  ;;  %vm919_vm6 = vmxor %vm778_vm1, %vm577_vm15  ;;  %v960_v51 = vsub.f32 0.0, %v326_v14  ;;  %v976_v55 = vsub.f32 0.0, %v327_v18 }
  0x1a   :  { %v928_v38 = vpop.eup %542  ;;  %v931_v39 = vadd.f32 1.0, %v910_v32  ;;  %552 = vlog2.f32 %v895_v26  ;;  %vm937_vm0 = vmxor %vm791_vm2, %vm577_vm15  ;;  %v1283_v56 = vmov 0  ;;  %v989_v58 = vsub.f32 0.0, %v328_v19 }
  0x1b   :  { %1275 = vst [vmem:[#allocation2_spill] sm:$0xff] %v928_v38  ;;  %v947_v48 = vadd.f32 1.0, %v928_v38  ;;  %554 = vlog2.f32 %v913_v33  ;;  %vm953_vm1 = vmxor %vm818_vm3, %vm577_vm15  ;;  %v991_v59 = vsub.f32 0.0, %v329_v23  ;;  %v997_v61 = vsub.f32 0.0, %v330_v24 }
  0x1c   :  { %556 = vlog2.f32 %v931_v39  ;;  %vm966_vm2 = vmxor %vm840_vm5, %vm577_vm15  ;;  %1282 = vst [vmem:[#allocation3_spill] sm:$0xff] %v976_v55  ;;  %vm349_vm5 = vcmp.ge.s32.totalorder %v692_v37, 0  ;;  %vm350_vm7 = vcmp.ge.s32.totalorder %v698_v40, 0  ;;  %vm351_vm11 = vcmp.ge.s32.totalorder %v703_v41, 0 }
  0x1d   :  { %558 = vlog2.f32 %v947_v48  ;;  %vm982_vm3 = vmxor %vm862_vm13, %vm577_vm15  ;;  %1286 = vst [vmem:[#allocation5_spill] sm:$0xff] %v989_v58  ;;  %vm347_vm13 = vcmp.ge.s32.totalorder %v682_v28, 0  ;;  %v578_v4 = vmov -0.75   ;;  %vm1288_vm9 = vcmp.eq.s32.totalorder %v687_v29, %v672_v17 }
  0x1e   :  { %v1284_v56 = vsel %vm982_vm3, 4294967295, %v1283_v56  ;;  %1287 = vst [vmem:[#allocation6_spill] sm:$0xff] %v991_v59  ;;  %560 = vrcp.f32 %v833_v3  ;;  %v355_v5 = vsel %vm267_vm8, -0.25, %v578_v4  ;;  %v356_v10 = vsel %vm1288_vm9, -0.25, %v578_v4 }
  0x1f   :  { %1285 = vst [vmem:[#allocation4_spill] sm:$0xff] %v1284_v56  ;;  %562 = vrcp.f32 %v855_v9  ;;  %vm1289_vm10 = vcmp.eq.s32.totalorder %v692_v37, %v672_v17  ;;  %vm1290_vm8 = vcmp.eq.s32.totalorder %v698_v40, %v672_v17  ;;  %vm1291_vm15 = vcmp.eq.s32.totalorder %v703_v41, %v672_v17  ;;  %v1101_v40 = vld [vmem:[%s1230_s2 + $0x18] sm:$0xff] }
  0x20   :  { %v545_v63 = vpop.eup %544  ;;  %564 = vrcp.f32 %v869_v16  ;;  %v357_v11 = vsel %vm1289_vm10, -0.25, %v578_v4  ;;  %v358_v18 = vsel %vm1290_vm8, -0.25, %v578_v4  ;;  %v359_v19 = vsel %vm1291_vm15, -0.25, %v578_v4 }
  0x21   :  { %v547_v0 = vpop.eup %546  ;;  %v1008_v1 = vmul.f32 0.6931472, %v545_v63  ;;  %566 = vrcp.f32 %v882_v21  ;;  %vm1293_vm9 = vcmp.eq.s32.totalorder %v708_v42, %v672_v17  ;;  %vm1295_vm10 = vcmp.eq.s32.totalorder %v716_v43, %v672_v17 }
  0x22   :  { %v549_v6 = vpop.eup %548  ;;  %v1015_v7 = vmul.f32 0.6931472, %v547_v0  ;;  %568 = vrcp.f32 %v895_v26  ;;  %v360_v0 = vsel %vm1293_vm9, -0.25, %v578_v4  ;;  %vm1297_vm15 = vcmp.eq.s32.totalorder %v721_v44, %v672_v17 }
  0x23   :  { %v551_v13 = vpop.eup %550  ;;  %v1024_v14 = vmul.f32 0.6931472, %v549_v6  ;;  %570 = vrcp.f32 %v913_v33  ;;  %v363_v50 = vsel %vm347_vm13, %v355_v5, 0.0  ;;  %vm1299_vm8 = vcmp.ge.s32.totalorder %v687_v29, 0  ;;  %v1089_v5 = vld [vmem:[%s1230_s2 + $0x10] sm:$0xff] }
  0x24   :  { %v553_v23 = vpop.eup %552  ;;  %v1033_v24 = vmul.f32 0.6931472, %v551_v13  ;;  %572 = vrcp.f32 %v931_v39  ;;  %v361_v13 = vsel %vm1295_vm10, -0.25, %v578_v4  ;;  %v364_v17 = vsel %vm1299_vm8, %v356_v10, 0.0 }
  0x25   :  { %v555_v6 = vpop.eup %554  ;;  %v1041_v60 = vmul.f32 0.6931472, %v553_v23  ;;  %574 = vrcp.f32 %v947_v48  ;;  %v362_v23 = vsel %vm1297_vm15, -0.25, %v578_v4  ;;  %v415_v4 = vld [vmem:[%s1231_s3] sm:$0xff]  ;;  %v365_v28 = vsel %vm349_vm5, %v357_v11, 0.0  ;;  %v417_v11 = vld [vmem:[%s1231_s3 + $0x10] sm:$0xff] }
  0x26   :  { %1292 = vst [vmem:[#allocation7_spill] sm:$0xff] %v1033_v24  ;;  %v557_v54 = vpop.eup %556  ;;  %v1049_v53 = vmul.f32 0.6931472, %v555_v6  ;;  %v366_v29 = vsel %vm350_vm7, %v358_v18, 0.0  ;;  %v367_v63 = vsel %vm351_vm11, %v359_v19, 0.0  ;;  %vm1300_vm13 = vcmp.ge.s32.totalorder %v708_v42, 0 }
  0x27   :  { %1294 = vst [vmem:[#allocation8_spill] sm:$0xff] %v1041_v60  ;;  %v559_v6 = vpop.eup %558  ;;  %v1064_v35 = vmul.f32 0.6931472, %v557_v54  ;;  %v368_v37 = vsel %vm1300_vm13, %v360_v0, 0.0  ;;  %vm1301_vm7 = vcmp.ge.s32.totalorder %v716_v43, 0  ;;  %v419_v19 = vsub.f32 %v411_v57, %v415_v4 }
  0x28   :  { %1296 = vst [vmem:[#allocation9_spill] sm:$0xff] %v1049_v53  ;;  %v561_v38 = vpop.eup %560  ;;  %v1078_v54 = vmul.f32 0.6931472, %v559_v6  ;;  %v369_v42 = vsel %vm1301_vm7, %v361_v13, 0.0  ;;  %v420_v0 = vsub.f32 %v412_v46, %v416_v30  ;;  %vm1302_vm11 = vcmp.ge.s32.totalorder %v721_v44, 0 }
  0x29   :  { %1298 = vst [vmem:[#allocation10_spill] sm:$0xff] %v1064_v35  ;;  %v563_v10 = vpop.eup %562  ;;  %v235_v60 = vmul.f32 %v561_v38, %v833_v3  ;;  %v418_v3 = vld [vmem:[%s1231_s3 + $0x18] sm:$0xff]  ;;  %v370_v58 = vsel %vm1302_vm11, %v362_v23, 0.0  ;;  %v1309_v34 = vsel %vm953_vm1, %v892_v25, 1.0 }
  0x2a   :  { %v565_v18 = vpop.eup %564  ;;  %v236_v41 = vmul.f32 %v563_v10, %v855_v9  ;;  %v346_v53 = vsub.f32 %v997_v61, %v1078_v54  ;;  %v421_v9 = vsub.f32 %v1089_v5, %v417_v11  ;;  %v422_v43 = vsub.f32 %v1101_v40, %v418_v3 }
  0x2b   :  { %v567_v6 = vpop.eup %566  ;;  %v237_v35 = vmul.f32 %v565_v18, %v869_v16  ;;  %v243_v59 = vsub.f32 2.0, %v235_v60  ;;  %v1121_v60 = vand.u32 2147483647, %v419_v19  ;;  %v1124_v4 = vand.u32 2147483647, %v420_v0 }
  0x2c   :  { %v569_v55 = vpop.eup %568  ;;  %v238_v56 = vmul.f32 %v567_v6, %v882_v21  ;;  %v244_v24 = vsub.f32 2.0, %v236_v41 }
  0x2d   :  { %v571_v57 = vpop.eup %570  ;;  %v239_v30 = vmul.f32 %v569_v55, %v895_v26  ;;  %v245_v46 = vsub.f32 2.0, %v237_v35  ;;  %v251_v16 = vmul.f32 %v561_v38, %v243_v59  ;;  %v1303_v26 = vsel %vm875_vm12, %v811_v62, 1.0  ;;  %v1313_v49 = vld [vmem:[#allocation7_spill] sm:$0xff] }
  0x2e   :  { %v573_v13 = vpop.eup %572  ;;  %v240_v61 = vmul.f32 %v571_v57, %v913_v33  ;;  %v246_v44 = vsub.f32 2.0, %v238_v56  ;;  %v252_v23 = vmul.f32 %v563_v10, %v244_v24  ;;  %v1304_v33 = vsel %vm888_vm4, %v830_v2, 1.0  ;;  %v1319_v52 = vld [vmem:[#allocation8_spill] sm:$0xff] }
  0x2f   :  { %v575_v21 = vpop.eup %574  ;;  %v241_v54 = vmul.f32 %v573_v13, %v931_v39  ;;  %v247_v5 = vsub.f32 2.0, %v239_v30  ;;  %v253_v11 = vmul.f32 %v565_v18, %v245_v46  ;;  %v299_v35 = vmul.f32 %v1303_v26, %v251_v16  ;;  %v1324_v26 = vld [vmem:[#allocation6_spill] sm:$0xff] }
  0x30   :  { %v242_v38 = vmul.f32 %v575_v21, %v947_v48  ;;  %v248_v59 = vsub.f32 2.0, %v240_v61  ;;  %v254_v40 = vmul.f32 %v567_v6, %v246_v44  ;;  %v300_v56 = vmul.f32 %v1304_v33, %v252_v23  ;;  %v1321_v44 = vld [vmem:[#allocation5_spill] sm:$0xff] }
  0x31   :  { %v249_v24 = vsub.f32 2.0, %v241_v54  ;;  %v255_v10 = vmul.f32 %v569_v55, %v247_v5  ;;  %v1305_v39 = vsel %vm901_vm14, %v852_v8, 1.0  ;;  %v371_v12 = vmul.f32 %v363_v50, %v299_v35 }
  0x32   :  { %v301_v3 = vmul.f32 %v1305_v39, %v253_v11  ;;  %v250_v18 = vsub.f32 2.0, %v242_v38  ;;  %v256_v62 = vmul.f32 %v571_v57, %v248_v59  ;;  %v1306_v48 = vsel %vm919_vm6, %v866_v15, 1.0 }
  0x33   :  { %v302_v6 = vmul.f32 %v1306_v48, %v254_v40  ;;  %v372_v41 = vmul.f32 %v364_v17, %v300_v56  ;;  %v257_v22 = vmul.f32 %v573_v13, %v249_v24  ;;  %v1307_v2 = vsel %vm937_vm0, %v879_v20, 1.0  ;;  %v1318_v13 = vld [vmem:[#allocation3_spill] sm:$0xff] }
  0x34   :  { %v303_v55 = vmul.f32 %v1307_v2, %v255_v10  ;;  %v373_v19 = vmul.f32 %v365_v28, %v301_v3  ;;  %v1308_v8 = vsub.f32 %v908_v31, %v1008_v1  ;;  %v258_v50 = vmul.f32 %v575_v21, %v250_v18 }
  0x35   :  { %v304_v0 = vmul.f32 %v1309_v34, %v256_v62  ;;  %v374_v15 = vmul.f32 %v366_v29, %v302_v6  ;;  %v1310_v17 = vsub.f32 %v926_v36, %v1015_v7  ;;  %v1311_v20 = vsel %vm966_vm2, %v910_v32, 1.0  ;;  %v1316_v29 = vld [vmem:[#allocation2_spill] sm:$0xff] }
  0x36   :  { %v379_v27 = vmul.f32 %v1308_v8, %v299_v35  ;;  %v305_v45 = vmul.f32 %v1311_v20, %v257_v22  ;;  %v375_v28 = vmul.f32 %v367_v63, %v303_v55  ;;  %v1312_v31 = vsub.f32 %v944_v47, %v1024_v14  ;;  %v1322_v63 = vld [vmem:[#allocation9_spill] sm:$0xff]  ;;  %v1325_v35 = vld [vmem:[#allocation10_spill] sm:$0xff] }
  0x37   :  { %v380_v57 = vmul.f32 %v1310_v17, %v300_v56  ;;  %v1314_v30 = vsub.f32 %v960_v51, %v1313_v49  ;;  %v1317_v16 = vsel %vm982_vm3, %v1316_v29, 1.0  ;;  %v376_v7 = vmul.f32 %v368_v37, %v304_v0 }
  0x38   :  { %v381_v1 = vmul.f32 %v1312_v31, %v301_v3  ;;  %v306_v36 = vmul.f32 %v1317_v16, %v258_v50  ;;  %v1320_v61 = vsub.f32 %v1318_v13, %v1319_v52  ;;  %v1323_v23 = vsub.f32 %v1321_v44, %v1322_v63 }
  0x39   :  { %v382_v25 = vmul.f32 %v1314_v30, %v302_v6  ;;  %v387_v47 = vmul.f32 %v379_v27, %v371_v12  ;;  %v388_v14 = vmul.f32 %v380_v57, %v372_v41  ;;  %v425_v54 = vand.u32 2147483647, %v421_v9  ;;  %v447_v6 = vld [vmem:[%s1232_s4] sm:$0xff]  ;;  %v448_v41 = vld [vmem:[%s1232_s4 + $0x8] sm:$0xff] }
  0x3a   :  { %v383_v32 = vmul.f32 %v1320_v61, %v303_v55  ;;  %v384_v21 = vmul.f32 %v1323_v23, %v304_v0  ;;  %v426_v5 = vand.u32 2147483647, %v422_v43  ;;  %v377_v51 = vmul.f32 %v369_v42, %v305_v45 }
  0x3b   :  { %v378_v11 = vmul.f32 %v370_v58, %v306_v36  ;;  %v1326_v38 = vsub.f32 %v1324_v26, %v1325_v35  ;;  %v389_v40 = vmul.f32 %v381_v1, %v373_v19  ;;  %v386_v37 = vmul.f32 %v346_v53, %v306_v36  ;;  %v449_v19 = vld [vmem:[%s1232_s4 + $0x10] sm:$0xff]  ;;  %v395_v26 = vld [vmem:[%s1225_s5] sm:$0x1] }
  0x3c   :  { %v390_v33 = vmul.f32 %v382_v25, %v374_v15  ;;  %v391_v56 = vmul.f32 %v383_v32, %v375_v28  ;;  %v396_v24 = vadd.f32 %v388_v14, %v387_v47  ;;  %v392_v10 = vmul.f32 %v384_v21, %v376_v7  ;;  %v450_v15 = vld [vmem:[%s1232_s4 + $0x18] sm:$0xff] }
  0x3d   :  { %v385_v59 = vmul.f32 %v1326_v38, %v305_v45  ;;  %vm427_vm12 = vcmp.lt.f32.partialorder %v1121_v60, 1.0  ;;  %vm428_vm4 = vcmp.lt.f32.partialorder %v1124_v4, 1.0  ;;  %vm429_vm14 = vcmp.lt.f32.partialorder %v425_v54, 1.0 }
  0x3e   :  { %v397_v39 = vadd.f32 %v396_v24, %v389_v40  ;;  %vm430_vm6 = vcmp.lt.f32.partialorder %v426_v5, 1.0  ;;  %v431_v42 = vmul.f32 0.5, %v1121_v60  ;;  %v432_v58 = vmul.f32 0.5, %v1124_v4 }
  0x3f   :  { %v433_v9 = vmul.f32 0.5, %v425_v54  ;;  %v434_v43 = vmul.f32 0.5, %v426_v5  ;;  %v521_v3 = vadd.f32 -0.5, %v1121_v60  ;;  %v522_v53 = vadd.f32 -0.5, %v1124_v4 }
  0x40   :  { %v398_v12 = vadd.f32 %v397_v39, %v390_v33  ;;  %v435_v18 = vmul.f32 %v431_v42, %v1121_v60  ;;  %v436_v62 = vmul.f32 %v432_v58, %v1124_v4  ;;  %v523_v48 = vadd.f32 -0.5, %v425_v54 }
  0x41   :  { %v437_v22 = vmul.f32 %v433_v9, %v425_v54  ;;  %v438_v2 = vmul.f32 %v434_v43, %v426_v5  ;;  %v524_v55 = vadd.f32 -0.5, %v426_v5  ;;  %v468_v8 = vadd.f32 %v448_v41, %v447_v6  ;;  %v467_v5 = vld [vmem:[%s1227_s7] sm:$0x1] }
  0x42   :  { %v393_v27 = vmul.f32 %v385_v59, %v377_v51  ;;  %v399_v50 = vadd.f32 %v398_v12, %v391_v56  ;;  %v443_v34 = vsel %vm427_vm12, %v435_v18, %v521_v3  ;;  %v444_v0 = vsel %vm428_vm4, %v436_v62, %v522_v53  ;;  %v451_v59 = vld [vmem:[%s1226_s6] sm:$0x1] }
  0x43   :  { %v445_v17 = vsel %vm429_vm14, %v437_v22, %v523_v48  ;;  %v446_v57 = vsel %vm430_vm6, %v438_v2, %v524_v55  ;;  %v452_v20 = vmul.f32 %v447_v6, %v443_v34  ;;  %v453_v45 = vmul.f32 %v448_v41, %v444_v0 }
  0x44   :  { %v394_v28 = vmul.f32 %v386_v37, %v378_v11  ;;  %v400_v31 = vadd.f32 %v399_v50, %v392_v10  ;;  %v454_v1 = vmul.f32 %v449_v19, %v445_v17  ;;  %v469_v49 = vadd.f32 %v468_v8, %v449_v19 }
  0x45   :  { %v455_v30 = vmul.f32 %v450_v15, %v446_v57  ;;  %v456_v60 = vadd.f32 %v453_v45, %v452_v20 }
  0x46   :  { %v401_v25 = vadd.f32 %v400_v31, %v393_v27  ;;  %v470_v46 = vadd.f32 %v469_v49, %v450_v15 }
  0x47   :  { %v457_v4 = vadd.f32 %v456_v60, %v454_v1 }
  0x48   :  { %v402_v29 = vadd.f32 %v401_v25, %v394_v28  ;;  %v471_v16 = vrot.slane %v470_v46, 4 }
  0x49   :  { %v458_v36 = vadd.f32 %v457_v4, %v455_v30 }
  0x4a   :  { %v403_v7 = vrot.slane %v402_v29, 4  ;;  %v472_v13 = vadd.f32 %v471_v16, %v470_v46 }
  0x4b   :  { %v459_v52 = vrot.slane %v458_v36, 4 }
  0x4c   :  { %v404_v61 = vadd.f32 %v403_v7, %v402_v29  ;;  %v473_v32 = vrot.slane %v472_v13, 2 }
  0x4d   :  { %v460_v44 = vadd.f32 %v459_v52, %v458_v36 }
  0x4e   :  { %v405_v63 = vrot.slane %v404_v61, 2  ;;  %v474_v23 = vadd.f32 %v473_v32, %v472_v13 }
  0x4f   :  { %v461_v21 = vrot.slane %v460_v44, 2 }
  0x50   :  { %v406_v47 = vadd.f32 %v405_v63, %v404_v61  ;;  %v475_v14 = vrot.slane %v474_v23, 1 }
  0x51   :  { %v462_v54 = vadd.f32 %v461_v21, %v460_v44 }
  0x52   :  { %v407_v51 = vrot.slane %v406_v47, 1  ;;  %v476_v11 = vadd.f32 %v475_v14, %v474_v23 }
  0x53   :  { %v463_v35 = vrot.slane %v462_v54, 1 }
  0x54   :  { %v408_v38 = vadd.f32 %v407_v51, %v406_v47  ;;  %v477_v40 = vadd.f32 %v476_v11, %v467_v5 }
  0x55   :  { %v464_v37 = vadd.f32 %v463_v35, %v462_v54 }
  0x56   :  { %v409_v33 = vadd.f32 %v408_v38, %v395_v26  ;;  %478 = vst [vmem:[%s1227_s7] sm:$0x1] %v477_v40 }
  0x57   :  { %v465_v56 = vadd.f32 %v464_v37, %v451_v59 }
  0x58   :  { %410 = vst [vmem:[%s1225_s5] sm:$0x1] %v409_v33 }
  0x59   :  { %466 = vst [vmem:[%s1226_s6] sm:$0x1] %v465_v56 }

</bundles_post_ra>
